<compile_context>
chip_gen: v5e
topology: v5e:2x2
jax: 0.10.0
libtpu: 0.0.40
codegen_flags: <defaults>
</compile_context>

<pallas_src>
import numpy as np
import jax
import jax.numpy as jnp
from jax.experimental import pallas as pl
from jax.experimental.pallas import tpu as pltpu


# ---------------------------------------------------------------------------
# Parameter construction (plain numpy / JAX, runs once in the wrapper)
# ---------------------------------------------------------------------------
def _gaussian_kernel_1d(ksize: int, sigma: float) -> np.ndarray:
    half = (ksize - 1) // 2
    xs = np.arange(-half, half + 1, dtype=np.float64)
    g = np.exp(-(xs ** 2) / (2.0 * sigma ** 2))
    g /= g.sum()
    return g.astype(np.float32)


def _reflect_index(i: int, n: int) -> int:
    # "reflect" padding (no edge repetition), matching torch F.pad reflect.
    if n == 1:
        return 0
    period = 2 * (n - 1)
    i = i % period
    if i < 0:
        i += period
    if i >= n:
        i = period - i
    return i


def _blur_matrix(n: int, ksize: int = 7, sigma: float = 1.5) -> np.ndarray:
    """Dense (n, n) matrix M s.t. M @ v is the 1-D Gaussian blur of v with
    reflect boundary handling folded in."""
    g = _gaussian_kernel_1d(ksize, sigma)
    half = (ksize - 1) // 2
    m = np.zeros((n, n), dtype=np.float32)
    for i in range(n):
        for k in range(-half, half + 1):
            j = _reflect_index(i + k, n)
            m[i, j] += g[k + half]
    return m


# ---------------------------------------------------------------------------
# Pallas kernel: one program == one batch element, slab shape (T*C, H*W)
# ---------------------------------------------------------------------------
def aggregate_kernel(x_ref, m2t_ref, wbd_ref, wsh_ref, b_ref, out_ref):
    x = x_ref[0]          # (T*C, H*W)   bf16  (all frames of this batch element)
    m2t = m2t_ref[...]    # (H*W, H*W)   bf16  transposed kron(Bh, Bw) blur matrix
    wbd = wbd_ref[...]    # (T*C, T*C)   bf16  kron(I_T, 0.5*w3)
    wsh = wsh_ref[...]    # (T*C, T*C)   bf16  kron(adj_T, 0.5*w3) (temporal shift)
    bias = b_ref[...]     # (T*C, 1)     f32   b3 + 0.5*w3.sum(1), tiled over T

    # Spatial Gaussian blur of every frame/channel: single lane-dense MXU matmul.
    blur = jnp.dot(x, m2t, preferred_element_type=jnp.float32)          # (T*C, HW) f32

    # Un-blurred current-frame term (atten 0.5 + post_conv folded into wbd).
    cur = jnp.dot(wbd, x, preferred_element_type=jnp.float32)           # (T*C, HW) f32

    # Blurred prev/next-neighbor term (temporal shift + zero padding + 0.5 + post_conv
    # folded into wsh; rows for t=0 / t=T-1 automatically get only one neighbor).
    nbr = jnp.dot(wsh, blur.astype(jnp.bfloat16),
                  preferred_element_type=jnp.float32)                   # (T*C, HW) f32

    out_ref[0] = (cur + nbr + bias).astype(out_ref.dtype)


# ---------------------------------------------------------------------------
# Wrapper
# ---------------------------------------------------------------------------
def aggregate_forward(x, frames, w3, b3, *, ksize=7, sigma=1.5):
    """x: (B*T, C, H, W) float32  ->  (B*T, C, H, W) float32."""
    BT, C, H, W = x.shape
    T = frames
    assert BT % T == 0
    B = BT // T
    HW = H * W
    TC = T * C

    # Dense 2-D blur operator on flattened (h, w); transposed so blur = x @ m2t.
    bh = _blur_matrix(H, ksize, sigma)
    bw = _blur_matrix(W, ksize, sigma)
    m2t = jnp.asarray(np.kron(bh, bw).T, dtype=jnp.bfloat16)            # (HW, HW)

    # Fold atten (weight 0.5, bias 0.5) into post_conv.
    w3e = 0.5 * w3                                                      # (C, C)
    b3e = b3 + 0.5 * jnp.sum(w3, axis=1)                                # (C,)

    eye_t = jnp.eye(T, dtype=jnp.float32)
    adj_t = jnp.eye(T, k=1, dtype=jnp.float32) + jnp.eye(T, k=-1, dtype=jnp.float32)
    wbd = jnp.kron(eye_t, w3e).astype(jnp.bfloat16)                     # (T*C, T*C)
    wsh = jnp.kron(adj_t, w3e).astype(jnp.bfloat16)                     # (T*C, T*C)
    b_bd = jnp.tile(b3e, T).reshape(TC, 1).astype(jnp.float32)          # (T*C, 1)

    # Lane-dense slab layout: (B, T*C, H*W); bf16 halves HBM read traffic.
    x_slab = x.reshape(B, TC, HW).astype(jnp.bfloat16)

    out = pl.pallas_call(
        aggregate_kernel,
        out_shape=jax.ShapeDtypeStruct((B, TC, HW), jnp.float32),
        grid_spec=pltpu.PrefetchScalarGridSpec(
            num_scalar_prefetch=0,
            grid=(B,),
            in_specs=[
                pl.BlockSpec((1, TC, HW), lambda b: (b, 0, 0)),   # x slab
                pl.BlockSpec((HW, HW), lambda b: (0, 0)),         # kron blur (fetched once)
                pl.BlockSpec((TC, TC), lambda b: (0, 0)),         # block-diag post_conv
                pl.BlockSpec((TC, TC), lambda b: (0, 0)),         # temporal-shift post_conv
                pl.BlockSpec((TC, 1), lambda b: (0, 0)),          # folded bias
            ],
            out_specs=pl.BlockSpec((1, TC, HW), lambda b: (b, 0, 0)),
        ),
        compiler_params=pltpu.CompilerParams(
            dimension_semantics=("parallel",)),
    )(x_slab, m2t, wbd, wsh, b_bd)

    return out.reshape(BT, C, H, W)


# ---------------------------------------------------------------------------
# Pure-JAX f32 reference (same math as the PyTorch module) for correctness
# ---------------------------------------------------------------------------
def reference(x, frames, w3, b3, *, ksize=7, sigma=1.5):
    BT, C, H, W = x.shape
    T = frames
    B = BT // T
    x5 = x.reshape(B, T, C, H, W)
    bh = jnp.asarray(_blur_matrix(H, ksize, sigma))
    bw = jnp.asarray(_blur_matrix(W, ksize, sigma))
    blur = jnp.einsum('hk,btckl,wl->btchw', bh, x5, bw)
    zero = jnp.zeros_like(blur[:, :1])
    blur_prev = jnp.concatenate([zero, blur[:, :-1]], axis=1)
    blur_next = jnp.concatenate([blur[:, 1:], zero], axis=1)
    pre = 0.5 * (x5 + blur_prev + blur_next) + 0.5
    out = jnp.einsum('oc,btchw->btohw', w3, pre) \
        + b3[None, None, :, None, None]
    return out.reshape(BT, C, H, W)


if __name__ == "__main__":
    B, T, C, H, W = 2, 4, 4, 16, 16   # frames=T, dim=C

    key = jax.random.PRNGKey(0)
    k_x, k_w, k_b = jax.random.split(key, 3)
    x = jax.random.normal(k_x, (B * T, C, H, W), dtype=jnp.float32)
    # post_conv (Conv3d(dim, dim, 1)) parameters, deterministic init.
    w3 = 0.1 * jax.random.normal(k_w, (C, C), dtype=jnp.float32)
    b3 = 0.1 * jax.random.normal(k_b, (C,), dtype=jnp.float32)

    out = aggregate_forward(x, T, w3, b3)
    out = jax.block_until_ready(out)

    ref = reference(x, T, w3, b3)
    assert out.shape == (B * T, C, H, W)
    max_err = float(np.max(np.abs(np.asarray(out) - np.asarray(ref))))
    # bf16 MXU operands with f32 accumulation -> tolerance relaxed vs. the all-f32 path.
    assert np.allclose(np.asarray(out), np.asarray(ref), atol=2e-2, rtol=2e-2), \
        f"Pallas output mismatch vs reference (max abs err {max_err})"

    print("KERNEL_OK")
</pallas_src>

<mosaic_0001>
module attributes {stable_mosaic.version = 11 : i64} {
  func.func @aggregate_kernel(%arg0: i32, %arg1: memref<1x16x256xbf16, #tpu.memory_space<vmem>>, %arg2: memref<256x256xbf16, #tpu.memory_space<vmem>>, %arg3: memref<16x16xbf16, #tpu.memory_space<vmem>>, %arg4: memref<16x16xbf16, #tpu.memory_space<vmem>>, %arg5: memref<16x1xf32, #tpu.memory_space<vmem>>, %arg6: memref<1x16x256xf32, #tpu.memory_space<vmem>>) attributes {dimension_semantics = [#tpu.dimension_semantics<parallel>], iteration_bounds = array<i64: 2>, scalar_prefetch = 0 : i64, scratch_operands = 0 : i64, tpu.core_type = #tpu.core_type<tc>, window_params = [{transform_indices = @transform_0, window_bounds = array<i64: 1, 16, 256>}, {pipeline_mode = #tpu.pipeline_mode<synchronous>, transform_indices = @transform_1, window_bounds = array<i64: 256, 256>}, {pipeline_mode = #tpu.pipeline_mode<synchronous>, transform_indices = @transform_2, window_bounds = array<i64: 16, 16>}, {pipeline_mode = #tpu.pipeline_mode<synchronous>, transform_indices = @transform_3, window_bounds = array<i64: 16, 16>}, {pipeline_mode = #tpu.pipeline_mode<synchronous>, transform_indices = @transform_4, window_bounds = array<i64: 16, 1>}, {transform_indices = @transform_5, window_bounds = array<i64: 1, 16, 256>}]} {
    %c0 = arith.constant 0 : index
    %c0_0 = arith.constant 0 : index
    %c0_1 = arith.constant 0 : index
    %0 = vector.load %arg1[%c0, %c0_0, %c0_1] : memref<1x16x256xbf16, #tpu.memory_space<vmem>>, vector<1x16x256xbf16>
    %1 = vector.shape_cast %0 : vector<1x16x256xbf16> to vector<16x256xbf16>
    %c0_2 = arith.constant 0 : index
    %c0_3 = arith.constant 0 : index
    %2 = vector.load %arg2[%c0_2, %c0_3] : memref<256x256xbf16, #tpu.memory_space<vmem>>, vector<256x256xbf16>
    %c0_4 = arith.constant 0 : index
    %c0_5 = arith.constant 0 : index
    %3 = vector.load %arg3[%c0_4, %c0_5] : memref<16x16xbf16, #tpu.memory_space<vmem>>, vector<16x16xbf16>
    %c0_6 = arith.constant 0 : index
    %c0_7 = arith.constant 0 : index
    %4 = vector.load %arg4[%c0_6, %c0_7] : memref<16x16xbf16, #tpu.memory_space<vmem>>, vector<16x16xbf16>
    %c0_8 = arith.constant 0 : index
    %c0_9 = arith.constant 0 : index
    %5 = vector.load %arg5[%c0_8, %c0_9] : memref<16x1xf32, #tpu.memory_space<vmem>>, vector<16x1xf32>
    %cst = arith.constant dense<0.000000e+00> : vector<16x256xf32>
    %6 = tpu.matmul %1, %2, %cst {dimension_numbers = #tpu.dot_dimension_numbers<[1], [0], [0], [1], [0, 0, 1, 1], [], []>} : vector<16x256xbf16>, vector<256x256xbf16>, vector<16x256xf32> -> vector<16x256xf32>
    %cst_10 = arith.constant dense<0.000000e+00> : vector<16x256xf32>
    %7 = tpu.matmul %3, %1, %cst_10 {dimension_numbers = #tpu.dot_dimension_numbers<[1], [0], [0], [1], [0, 0, 1, 1], [], []>} : vector<16x16xbf16>, vector<16x256xbf16>, vector<16x256xf32> -> vector<16x256xf32>
    %8 = arith.truncf %6 : vector<16x256xf32> to vector<16x256xbf16>
    %cst_11 = arith.constant dense<0.000000e+00> : vector<16x256xf32>
    %9 = tpu.matmul %4, %8, %cst_11 {dimension_numbers = #tpu.dot_dimension_numbers<[1], [0], [0], [1], [0, 0, 1, 1], [], []>} : vector<16x16xbf16>, vector<16x256xbf16>, vector<16x256xf32> -> vector<16x256xf32>
    %10 = arith.addf %7, %9 : vector<16x256xf32>
    %11 = vector.broadcast %5 : vector<16x1xf32> to vector<16x256xf32>
    %12 = arith.addf %10, %11 : vector<16x256xf32>
    %c0_12 = arith.constant 0 : index
    %c0_13 = arith.constant 0 : index
    %c0_14 = arith.constant 0 : index
    %13 = vector.load %arg6[%c0_12, %c0_13, %c0_14] : memref<1x16x256xf32, #tpu.memory_space<vmem>>, vector<1x16x256xf32>
    %14 = vector.shape_cast %13 : vector<1x16x256xf32> to vector<16x256xf32>
    %15 = vector.shape_cast %12 : vector<16x256xf32> to vector<1x16x256xf32>
    tpu.vector_store %arg6[%c0_12, %c0_13, %c0_14], %15 {strides = array<i32>} : memref<1x16x256xf32, #tpu.memory_space<vmem>>, vector<1x16x256xf32>,
    return
  }
  func.func @transform_0(%arg0: i32) -> (i32, i32, i32) {
    %c0_i32 = arith.constant 0 : i32
    %c0_i32_0 = arith.constant 0 : i32
    %c0_i32_1 = arith.constant 0 : i32
    return %arg0, %c0_i32, %c0_i32_0 : i32, i32, i32
  }
  func.func @transform_1(%arg0: i32) -> (i32, i32) {
    %c0_i32 = arith.constant 0 : i32
    %c0_i32_0 = arith.constant 0 : i32
    %c0_i32_1 = arith.constant 0 : i32
    return %c0_i32, %c0_i32_0 : i32, i32
  }
  func.func @transform_2(%arg0: i32) -> (i32, i32) {
    %c0_i32 = arith.constant 0 : i32
    %c0_i32_0 = arith.constant 0 : i32
    %c0_i32_1 = arith.constant 0 : i32
    return %c0_i32, %c0_i32_0 : i32, i32
  }
  func.func @transform_3(%arg0: i32) -> (i32, i32) {
    %c0_i32 = arith.constant 0 : i32
    %c0_i32_0 = arith.constant 0 : i32
    %c0_i32_1 = arith.constant 0 : i32
    return %c0_i32, %c0_i32_0 : i32, i32
  }
  func.func @transform_4(%arg0: i32) -> (i32, i32) {
    %c0_i32 = arith.constant 0 : i32
    %c0_i32_0 = arith.constant 0 : i32
    %c0_i32_1 = arith.constant 0 : i32
    return %c0_i32, %c0_i32_0 : i32, i32
  }
  func.func @transform_5(%arg0: i32) -> (i32, i32, i32) {
    %c0_i32 = arith.constant 0 : i32
    %c0_i32_0 = arith.constant 0 : i32
    %c0_i32_1 = arith.constant 0 : i32
    return %arg0, %c0_i32, %c0_i32_0 : i32, i32, i32
  }
}

</mosaic_0001>

<bundles_post_ra>
// kernel: tpu_custom_call.1
= control target key start
LH: loop header
LB: loop body
LE: loop exit
PB: predicated region body
PF: predicated region fallthrough
CT: control target
= control target key end

     0   :  { %10 = vsyncpa [#allocation3], 0  ;;  %s1321_s0 = inlined_call_operand.hbm [shape: bf16[2,16,256], index: 0, kind: input, shape index: {}]   ;;  %s1322_s1 = inlined_call_operand.hbm [shape: bf16[256,256], index: 1, kind: input, shape index: {}]   ;;  %s1323_s2 = inlined_call_operand.vmem [shape: bf16[16,16], index: 2, kind: input, shape index: {}]   ;;  %s1324_s3 = inlined_call_operand.vmem [shape: bf16[16,16], index: 3, kind: input, shape index: {}]   ;;  %s1325_s4 = inlined_call_operand.vmem [shape: f32[16,1], index: 4, kind: input, shape index: {}]   ;;  %s1326_s5 = inlined_call_operand.hbm [shape: f32[2,16,256], index: 5, kind: output, shape index: {}]  }
   0x1   :  { %12 = vsyncpa [#allocation3 + $0x1], 0 }
   0x2   :  { %13 = vsyncpa [#allocation6], 0 }
   0x3   :  { %14 = vsyncpa [#allocation4], 0 }
   0x4   :  { %16 = vsyncpa [#allocation4 + $0x1], 0  ;;  %s1154_s18 = smov 0   ;;  %s1156_s19 = smov 0  }
   0x5   :  { %s1158_s20 = smov 0   ;;  %s1160_s21 = smov 0  }
   0x6 LB: > { %s1175_s22 = sadd.s32 4294967295, %s1116_s21   ;;  %s721_s23 = sadd.s32 4294967294, %s1116_s21   ;;  %s1116_s21 = sphi %s1160_s21, %s1338_s21   ;;  %s1112_s20 = sphi %s1158_s20, %s1337_s20   ;;  %s1108_s19 = sphi %s1156_s19, %s1336_s19   ;;  %s1104_s18 = sphi %s1154_s18, %s1335_s18  }
   0x7   : > { %p42_p0 = scmp.ne.s32.totalorder %s1108_s19, %s1104_s18  ;;  %p43_p1 = scmp.eq.s32.totalorder %s1175_s22, 0 }
   0x8   : > { %p150_p2 = scmp.eq.s32.totalorder %s1175_s22, 1  ;;  %p156_p3 = scmp.eq.s32.totalorder %s721_s23, 1 }
   0x9   : > { %p1184_p4 = por %p43_p1, %p42_p0  ;;  %p722_p5 = scmp.ge.s32.totalorder %s1116_s21, 1 }
   0xa   : > { %p1189_p6 = por %p156_p3, %p42_p0  ;;  %p163_p7 = scmp.lt.s32.totalorder %s1116_s21, 3 }
   0xb   : > { %s174_s28 = sshll.u32 %s1322_s1, 4  ;;  %s1118_s30 = smov [#allocation5]   ;;  %s175_s28 = int_to_ptr.hbm [resolvable:$true] %s174_s28 }
   0xc   : > { %p1197_p8 = pnand %p722_p5, %p163_p7  ;;  %s176_s6 = sshll.u32 %s1118_s30, 4  ;;  %s177_s6 = int_to_ptr.vmem [resolvable:$true] %s176_s6 }
   0xd   : > { %s1207_s7 = sadd.s32 1, %s1116_s21   ;;  %s1327_s8 = smov 128  }
   0xe   : > { %p931_p9 = pneg %p1197_p8  ;;  %s1120_s9 = smov 8  }
   0xf   : > { %s26_s10 = ssub.s32 %s1116_s21, %s1207_s7  ;;  %s29_s11 = sadd.s32 1, %s1112_s20 }
  0x10   : > { %p932_p10 = pnand %p931_p9, %p43_p1  ;;  %p27_p12 = scmp.eq.s32.totalorder %s26_s10, 0 }
  0x11   : > { %p36_p13 = scmp.ne.s32.totalorder %s1112_s20, %s1108_s19  ;;  %p37_p0 = scmp.eq.s32.totalorder %s1116_s21, 0 }
  0x12   : > { %934 = dma.hbm_to_vmem [thread:$0]  (!%p932_p10), %s175_s28, 4096, %s177_s6, [#allocation6], %s1327_s8, %s1327_s8, %s1120_s9  }
  0x13   : > { %s1219_s12 = scalar_select %p27_p12, %s1112_s20, %s29_s11  }
  0x14   : > { %p1223_p3 = por %p150_p2, %p36_p13  ;;  %p944_p5 = scmp.lt.s32.totalorder %s1116_s21, 2 }
  0x15   : > { %s199_s14 = sand.u32 1, %s1112_s20   ;;  %s885_s15 = sshll.u32 %s1116_s21, 4 }
  0x16   : > { %p38_p7 = por %p37_p0, %p36_p13  ;;  %s725_s16 = sshll.u32 %s199_s14, 4 }
  0x17   : > { %s208_s26 = scalar_lea.hbm %s1321_s0, %s885_s15  ;;  %s203_s28 = scalar_lea.vmem [#allocation2], %s725_s16 }
  0x18   : > { %s209_s27 = sshll.u32 %s208_s26, 4  ;;  %s211_s30 = sshll.u32 %s203_s28, 4  ;;  %s210_s27 = int_to_ptr.hbm [resolvable:$true] %s209_s27  ;;  %s212_s30 = int_to_ptr.vmem [resolvable:$true] %s211_s30 }
  0x19   : > { %p1233_p9 = pnand %p944_p5, %p38_p7  ;;  %s200_s10 = scalar_lea.sflag [#allocation3], %s199_s14 }
  0x1a   : > { %s1016_s11 = sshra.s32 %s210_s27, 4  ;;  %s1023_s16 = scalar_lea.hbm %s1321_s0, 32  ;;  %s1017_s11 = int_to_ptr.hbm [resolvable:$true] %s1016_s11 }
  0x1b   : > { %s1018_s8 = scalar_lea.hbm %s1017_s11, 16  ;;  %p1020_p10 = pneg %p1233_p9 }
  0x1c   : > { %p1019_p2 = scmp.ne.s32.totalorder %s1017_s11, %s1018_s8  ;;  %p1024_p0 = scmp.lt.s32.totalorder %s1017_s11, %s1321_s0 }
  0x1d   : > { %p1025_p5 = scmp.lt.s32.totalorder %s1023_s16, %s1018_s8 }
  0x1e   : > { %p1021_p12 = pnand %p1020_p10, %p1019_p2 }
  0x1f   : > { %p1026_p7 = por %p1025_p5, %p1024_p0 }
  0x20   : > { %p1022_p13 = pneg %p1021_p12 }
  0x22   : > { %p1027_p11 = pnand %p1026_p7, %p1022_p13 }
  0x24   : > { %1030 = shalt.err (!%p1027_p11)
}
  0x25   : > { %s1333_s14 = smov 128   ;;  %223 = sbr.rel (%p1197_p8) target bundleno = 371 (0x173), region = 40 }
  0x26   : > { %938 = dma.hbm_to_vmem [thread:$0]  (!%p1233_p9), %s210_s27, 256, %s212_s30, %s200_s10, %s1333_s14, %s1333_s14, %s1120_s9  }
  0x27   : > { %s1253_s28 = sand.u32 (!%p1197_p8), 1, %s1108_s19  }
  0x28   : > { %s729_s11 = sshll.u32 (!%p1197_p8), %s1253_s28, 4  ;;  %s226_s8 = scalar_lea.sflag (!%p1197_p8), [#allocation3], %s1253_s28 }
  0x29   : > { %s1257_s15 = scalar_lea.vmem (!%p1197_p8), [#allocation2], %s729_s11 }
  0x2a   : > { %1091 = dma.done.wait (%p1184_p4), %s226_s8, 256  }
  0x2b   : > { %1093 = vsyncadd (%p1184_p4), %s226_s8, 4294967040 }
  0x2c   : > { %1095 = dma.done.wait (%p43_p1), [#allocation6], 4096  }
  0x2d   : > { %1097 = vsyncadd (%p43_p1), [#allocation6], 4294963200  ;;  %v798_v0 = vld [vmem:[#allocation5 + $0x70] sm:$0xf]  ;;  %v903_v1 = vld [vmem:[#allocation5 + $0x74] sm:$0xf0] }
  0x2e   : > { %v862_v2 = vld [vmem:[#allocation5 + $0xf0] sm:$0xf]  ;;  %v799_v3 = vor.u32 %v903_v1, %v798_v0  ;;  %v919_v4 = vld [vmem:[#allocation5 + $0xf4] sm:$0xf0]  ;;  %v902_v5 = vld [vmem:[#allocation5 + $0x74] sm:$0xf] }
  0x2f   : > { %v800_v6 = vld [vmem:[#allocation5 + $0x78] sm:$0xf0]  ;;  %v863_v7 = vor.u32 %v919_v4, %v862_v2  ;;  %v918_v9 = vld [vmem:[#allocation5 + $0xf4] sm:$0xf]  ;;  %v790_v11 = vld [vmem:[#allocation5 + $0x60] sm:$0xf] }
  0x30   : > { %v803_v8 = vor.u32 %v902_v5, %v800_v6  ;;  %v864_v10 = vld [vmem:[#allocation5 + $0xf8] sm:$0xf0]  ;;  %473 = vmatpush.bf16.msra.mxu0 %v799_v3  ;;  %v901_v13 = vld [vmem:[#allocation5 + $0x64] sm:$0xf0]  ;;  %v854_v14 = vld [vmem:[#allocation5 + $0xe0] sm:$0xf] }
  0x31   : > { %v867_v12 = vor.u32 %v918_v9, %v864_v10  ;;  %v917_v15 = vld [vmem:[#allocation5 + $0xe4] sm:$0xf0]  ;;  %487 = vmatpush.bf16.msra.mxu1 %v863_v7  ;;  %v791_v16 = vor.u32 %v901_v13, %v790_v11  ;;  %v900_v18 = vld [vmem:[#allocation5 + $0x64] sm:$0xf]  ;;  %v792_v19 = vld [vmem:[#allocation5 + $0x68] sm:$0xf0] }
  0x32   : > { %501 = vmatpush.bf16.msra.mxu2 %v803_v8  ;;  %v855_v17 = vor.u32 %v917_v15, %v854_v14  ;;  %v916_v20 = vld [vmem:[#allocation5 + $0xe4] sm:$0xf]  ;;  %v795_v21 = vor.u32 %v900_v18, %v792_v19  ;;  %v856_v22 = vld [vmem:[#allocation5 + $0xe8] sm:$0xf0]  ;;  %v782_v23 = vld [vmem:[#allocation5 + $0x50] sm:$0xf] }
  0x33   : > { %515 = vmatpush.bf16.msra.mxu3 %v867_v12  ;;  %v899_v24 = vld [vmem:[#allocation5 + $0x54] sm:$0xf0]  ;;  %v859_v25 = vor.u32 %v916_v20, %v856_v22  ;;  %v846_v26 = vld [vmem:[#allocation5 + $0xd0] sm:$0xf]  ;;  %v898_v28 = vld [vmem:[#allocation5 + $0x54] sm:$0xf] }
  0x34   : > { %v915_v27 = vld [vmem:[#allocation5 + $0xd4] sm:$0xf0]  ;;  %474 = vmatpush.bf16.msra.mxu0 %v791_v16  ;;  %v783_v29 = vor.u32 %v899_v24, %v782_v23  ;;  %v784_v30 = vld [vmem:[#allocation5 + $0x58] sm:$0xf0]  ;;  %v914_v31 = vld [vmem:[#allocation5 + $0xd4] sm:$0xf] }
  0x35   : > { %v848_v32 = vld [vmem:[#allocation5 + $0xd8] sm:$0xf0]  ;;  %488 = vmatpush.bf16.msra.mxu1 %v855_v17  ;;  %v847_v33 = vor.u32 %v915_v27, %v846_v26  ;;  %v787_v34 = vor.u32 %v898_v28, %v784_v30  ;;  %v774_v35 = vld [vmem:[#allocation5 + $0x40] sm:$0xf]  ;;  %v897_v36 = vld [vmem:[#allocation5 + $0x44] sm:$0xf0] }
  0x36   : > { %502 = vmatpush.bf16.msra.mxu2 %v795_v21  ;;  %v838_v37 = vld [vmem:[#allocation5 + $0xc0] sm:$0xf]  ;;  %v851_v38 = vor.u32 %v914_v31, %v848_v32  ;;  %v913_v39 = vld [vmem:[#allocation5 + $0xc4] sm:$0xf0]  ;;  %v896_v40 = vld [vmem:[#allocation5 + $0x44] sm:$0xf]  ;;  %v775_v44 = vor.u32 %v897_v36, %v774_v35 }
  0x37   : > { %516 = vmatpush.bf16.msra.mxu3 %v859_v25  ;;  %v776_v41 = vld [vmem:[#allocation5 + $0x48] sm:$0xf0]  ;;  %v912_v42 = vld [vmem:[#allocation5 + $0xc4] sm:$0xf]  ;;  %v839_v45 = vor.u32 %v913_v39, %v838_v37  ;;  %v766_v47 = vld [vmem:[#allocation5 + $0x30] sm:$0xf] }
  0x38   : > { %v840_v43 = vld [vmem:[#allocation5 + $0xc8] sm:$0xf0]  ;;  %475 = vmatpush.bf16.msra.mxu0 %v783_v29  ;;  %v779_v46 = vor.u32 %v896_v40, %v776_v41  ;;  %v895_v48 = vld [vmem:[#allocation5 + $0x34] sm:$0xf0]  ;;  %v830_v49 = vld [vmem:[#allocation5 + $0xb0] sm:$0xf] }
  0x39   : > { %489 = vmatpush.bf16.msra.mxu1 %v847_v33  ;;  %v843_v50 = vor.u32 %v912_v42, %v840_v43  ;;  %v911_v51 = vld [vmem:[#allocation5 + $0xb4] sm:$0xf0]  ;;  %v894_v52 = vld [vmem:[#allocation5 + $0x34] sm:$0xf]  ;;  %v768_v53 = vld [vmem:[#allocation5 + $0x38] sm:$0xf0]  ;;  %v767_v56 = vor.u32 %v895_v48, %v766_v47 }
  0x3a   : > { %503 = vmatpush.bf16.msra.mxu2 %v787_v34  ;;  %v910_v54 = vld [vmem:[#allocation5 + $0xb4] sm:$0xf]  ;;  %v832_v55 = vld [vmem:[#allocation5 + $0xb8] sm:$0xf0]  ;;  %v831_v57 = vor.u32 %v911_v51, %v830_v49  ;;  %v771_v58 = vor.u32 %v894_v52, %v768_v53  ;;  %v758_v59 = vld [vmem:[#allocation5 + $0x20] sm:$0xf] }
  0x3b   : > { %517 = vmatpush.bf16.msra.mxu3 %v851_v38  ;;  %v893_v60 = vld [vmem:[#allocation5 + $0x24] sm:$0xf0]  ;;  %v822_v61 = vld [vmem:[#allocation5 + $0xa0] sm:$0xf]  ;;  %v835_v62 = vor.u32 %v910_v54, %v832_v55  ;;  %v892_v0 = vld [vmem:[#allocation5 + $0x24] sm:$0xf] }
  0x3c   : > { %476 = vmatpush.bf16.msra.mxu0 %v775_v44  ;;  %v909_v63 = vld [vmem:[#allocation5 + $0xa4] sm:$0xf0]  ;;  %v760_v1 = vld [vmem:[#allocation5 + $0x28] sm:$0xf0]  ;;  %v908_v2 = vld [vmem:[#allocation5 + $0xa4] sm:$0xf]  ;;  %v759_v4 = vor.u32 %v893_v60, %v758_v59 }
  0x3d   : > { %490 = vmatpush.bf16.msra.mxu1 %v839_v45  ;;  %v824_v3 = vld [vmem:[#allocation5 + $0xa8] sm:$0xf0]  ;;  %v823_v5 = vor.u32 %v909_v63, %v822_v61  ;;  %v763_v6 = vor.u32 %v892_v0, %v760_v1  ;;  %v750_v7 = vld [vmem:[#allocation5 + $0x10] sm:$0xf]  ;;  %v891_v8 = vld [vmem:[#allocation5 + $0x14] sm:$0xf0] }
  0x3e   : > { %504 = vmatpush.bf16.msra.mxu2 %v779_v46  ;;  %v814_v9 = vld [vmem:[#allocation5 + $0x90] sm:$0xf]  ;;  %v827_v10 = vor.u32 %v908_v2, %v824_v3  ;;  %v907_v11 = vld [vmem:[#allocation5 + $0x94] sm:$0xf0]  ;;  %v890_v12 = vld [vmem:[#allocation5 + $0x14] sm:$0xf]  ;;  %v751_v16 = vor.u32 %v891_v8, %v750_v7 }
  0x3f   : > { %518 = vmatpush.bf16.msra.mxu3 %v843_v50  ;;  %v752_v13 = vld [vmem:[#allocation5 + $0x18] sm:$0xf0]  ;;  %v906_v14 = vld [vmem:[#allocation5 + $0x94] sm:$0xf]  ;;  %v815_v17 = vor.u32 %v907_v11, %v814_v9  ;;  %v742_v19 = vld [vmem:[#allocation5] sm:$0xf] }
  0x40   : > { %477 = vmatpush.bf16.msra.mxu0 %v767_v56  ;;  %v816_v15 = vld [vmem:[#allocation5 + $0x98] sm:$0xf0]  ;;  %v755_v18 = vor.u32 %v890_v12, %v752_v13  ;;  %v889_v20 = vld [vmem:[#allocation5 + $0x4] sm:$0xf0]  ;;  %v806_v21 = vld [vmem:[#allocation5 + $0x80] sm:$0xf] }
  0x41   : > { %491 = vmatpush.bf16.msra.mxu1 %v831_v57  ;;  %v819_v22 = vor.u32 %v906_v14, %v816_v15  ;;  %v905_v23 = vld [vmem:[#allocation5 + $0x84] sm:$0xf0]  ;;  %v888_v24 = vld [vmem:[#allocation5 + $0x4] sm:$0xf]  ;;  %v744_v25 = vld [vmem:[#allocation5 + $0x8] sm:$0xf0]  ;;  %v743_v28 = vor.u32 %v889_v20, %v742_v19 }
  0x42   : > { %505 = vmatpush.bf16.msra.mxu2 %v771_v58  ;;  %v904_v26 = vld [vmem:[#allocation5 + $0x84] sm:$0xf]  ;;  %v808_v27 = vld [vmem:[#allocation5 + $0x88] sm:$0xf0]  ;;  %v734_v29 = vld [vmem:[%s1257_s15] sm:$0xf]  ;;  %v807_v31 = vor.u32 %v905_v23, %v806_v21  ;;  %v747_v32 = vor.u32 %v888_v24, %v744_v25 }
  0x43   : > { %519 = vmatpush.bf16.msra.mxu3 %v835_v62  ;;  %v887_v30 = vld [vmem:[%s1257_s15 + $0x4] sm:$0xf0]  ;;  %v886_v33 = vld [vmem:[%s1257_s15 + $0x4] sm:$0xf]  ;;  %v736_v34 = vld [vmem:[%s1257_s15 + $0x8] sm:$0xf0]  ;;  %v811_v35 = vor.u32 %v904_v26, %v808_v27 }
  0x44   : > { %478 = vmatpush.bf16.msra.mxu0 %v759_v4  ;;  %v735_v36 = vor.u32 %v887_v30, %v734_v29  ;;  %v739_v37 = vor.u32 %v886_v33, %v736_v34  ;;  %v920_v38 = vld [vmem:[%s1323_s2] sm:$0xff]  ;;  %vm536_vm0 = vcmask 130048   ;;  %v1121_v40 = vmov 0   ;;  %v302_v41 = vld [vmem:[%s1325_s4 + $0x8] sm:$0xff]  ;;  %s731_s16 = sshll.u32 %s1253_s28, 5  ;;  %s922_s26 = sshll.u32 %s1175_s22, 5 }
  0x45   : > { %492 = vmatpush.bf16.msra.mxu1 %v823_v5  ;;  %v301_v39 = vld [vmem:[%s1325_s4] sm:$0xff]  ;;  %985 = vset.pattern.permute.xlu0 %v1121_v40  ;;  %s261_s23 = scalar_lea.vmem [#allocation7], %s731_s16  ;;  %s634_s8 = scalar_lea.hbm %s1326_s5, %s922_s26 }
  0x46   : > { %506 = vmatpush.bf16.msra.mxu2 %v763_v6  ;;  %606 = vperm.xlu0 %985, %v301_v39   ;;  %v921_v51 = vld [vmem:[%s1324_s3] sm:$0xff]  ;;  %s635_s15 = sshll.u32 %s261_s23, 4  ;;  %s637_s24 = sshll.u32 %s634_s8, 4  ;;  %s636_s15 = int_to_ptr.vmem [resolvable:$true] %s635_s15  ;;  %s638_s24 = int_to_ptr.hbm [resolvable:$true] %s637_s24 }
  0x47   : > { %520 = vmatpush.bf16.msra.mxu3 %v827_v10  ;;  %s623_s22 = scalar_lea.sflag [#allocation4], %s1253_s28  ;;  %s1060_s29 = sshra.s32 %s638_s24, 4  ;;  %s1061_s29 = int_to_ptr.hbm [resolvable:$true] %s1060_s29 }
  0x48   : > { %479 = vmatpush.bf16.msra.mxu0 %v751_v16  ;;  %s1062_s9 = scalar_lea.hbm %s1061_s29, 32  ;;  %s1066_s6 = scalar_lea.hbm %s1326_s5, 64 }
  0x49   : > { %493 = vmatpush.bf16.msra.mxu1 %v815_v17  ;;  %p1063_p1 = scmp.ne.s32.totalorder %s1061_s29, %s1062_s9  ;;  %p1067_p11 = scmp.lt.s32.totalorder %s1061_s29, %s1326_s5 }
  0x4a   : > { %507 = vmatpush.bf16.msra.mxu2 %v755_v18  ;;  %p1068_p9 = scmp.lt.s32.totalorder %s1066_s6, %s1062_s9 }
  0x4b   : > { %521 = vmatpush.bf16.msra.mxu3 %v819_v22  ;;  %p1064_p4 = pnand %p1063_p1, %p1223_p3 }
  0x4c   : > { %480 = vmatpush.bf16.msra.mxu0 %v743_v28  ;;  %p1069_p2 = por %p1068_p9, %p1067_p11 }
  0x4d   : > { %494 = vmatpush.bf16.msra.mxu1 %v807_v31  ;;  %p1065_p8 = pneg %p1064_p4 }
  0x4e   : > { %508 = vmatpush.bf16.msra.mxu2 %v747_v32  ;;  %611 = vperm.xlu0 %985, %v302_v41  }
  0x4f   : > { %522 = vmatpush.bf16.msra.mxu3 %v811_v35  ;;  %481 = vmatmul.bf16.vlgmr.msra.gmra.mxu0 %v735_v36  ;;  %p1070_p10 = pnand %p1069_p2, %p1065_p8 }
  0x50   : > { %495 = vmatmul.bf16.vlgmr.msra.gmra.mxu1 %v739_v37 }
  0x51   : > { %509 = vmatmul.bf16.vlgmr.msra.gmra.mxu2 %v735_v36 }
  0x52   : > { %583 = vmatpush.bf16.msrb.mxu2 %v735_v36  ;;  %523 = vmatmul.bf16.vlgmr.msra.gmra.mxu3 %v739_v37 }
  0x53   : > { %597 = vmatpush.bf16.msrb.mxu3 %v739_v37 }
  0x61   : > { %878 = vmatmul.msk.bf16.vlgmr.msrb.gmra.mxu2 %vm536_vm0, %v920_v38 }
  0x62   : > { %879 = vmatmul.msk.bf16.vlgmr.msrb.gmra.mxu3 %vm536_vm0, %v920_v38 }
  0xb8   : > { %v607_v59 = vpop.permute.xlu0 %606 }
  0xc0   : > { %v612_v5 = vpop.permute.xlu0 %611 }
  0xcc   : > { %v482_v42 = vpop.f32.mrf.mxu0 }
  0xcd   : > { %v496_v43 = vpop.f32.mrf.mxu1 }
  0xce   : > { %v497_v48 = vadd.f32 %v496_v43, %v482_v42 }
  0xd4   : > { %v510_v44 = vpop.f32.mrf.mxu2  ;;  %v484_v46 = vpop.f32.mrf.mxu0 }
  0xd5   : > { %v524_v45 = vpop.f32.mrf.mxu3  ;;  %v498_v47 = vpop.f32.mrf.mxu1 }
  0xd6   : > { %v499_v49 = vadd.f32 %v498_v47, %v484_v46  ;;  %v525_v54 = vadd.f32 %v524_v45, %v510_v44 }
  0xd8   : > { %v529_v50 = vpack.c.bf16 %v499_v49, %v497_v48 }
  0xda   : > { %547 = vmatpush.bf16.msrb.mxu0 %v529_v50 }
  0xdc   : > { %v512_v52 = vpop.f32.mrf.mxu2 }
  0xdd   : > { %v526_v53 = vpop.f32.mrf.mxu3  ;;  %872 = vmatmul.msk.bf16.vlgmr.msrb.gmra.mxu0 %vm536_vm0, %v921_v51 }
  0xde   : > { %v527_v55 = vadd.f32 %v526_v53, %v512_v52 }
  0xe0   : > { %v530_v56 = vpack.c.bf16 %v527_v55, %v525_v54 }
  0xe2   : > { %561 = vmatpush.bf16.msrb.mxu1 %v530_v56 }
  0xe4   : > { %v585_v57 = vpop.f32.mrf.mxu2 }
  0xe5   : > { %873 = vmatmul.msk.bf16.vlgmr.msrb.gmra.mxu1 %vm536_vm0, %v921_v51  ;;  %v599_v62 = vpop.f32.mrf.mxu3 }
  0xec   : > { %v587_v2 = vpop.f32.mrf.mxu2 }
  0xed   : > { %v601_v8 = vpop.f32.mrf.mxu3 }
 0x15a   : > { %v549_v58 = vpop.f32.mrf.mxu0 }
 0x15b   : > { %v586_v60 = vadd.f32 %v585_v57, %v549_v58 }
 0x15d   : > { %v614_v61 = vadd.f32 %v607_v59, %v586_v60 }
 0x15f   : > { %618 = vst [vmem:[%s261_s23] sm:$0xff] %v614_v61 }
 0x162   : > { %v563_v63 = vpop.f32.mrf.mxu1  ;;  %v551_v1 = vpop.f32.mrf.mxu0 }
 0x163   : > { %v600_v0 = vadd.f32 %v599_v62, %v563_v63  ;;  %v588_v3 = vadd.f32 %v587_v2, %v551_v1 }
 0x165   : > { %v615_v4 = vadd.f32 %v607_v59, %v600_v0  ;;  %v616_v6 = vadd.f32 %v612_v5, %v588_v3 }
 0x167   : > { %619 = vst [vmem:[%s261_s23 + $0x8] sm:$0xff] %v615_v4 }
 0x168   : > { %620 = vst [vmem:[%s261_s23 + $0x10] sm:$0xff] %v616_v6 }
 0x16a   : > { %v565_v7 = vpop.f32.mrf.mxu1 }
 0x16b   : > { %v602_v9 = vadd.f32 %v601_v8, %v565_v7 }
 0x16d   : > { %v617_v10 = vadd.f32 %v612_v5, %v602_v9 }
 0x16f   : > { %621 = vst [vmem:[%s261_s23 + $0x18] sm:$0xff] %v617_v10 }
 0x170   : > { %1073 = shalt.err (!%p1070_p10)
}
 0x171   : > { %s1122_s28 = smov 256   ;;  %s1123_s16 = smov 16  }
 0x172   : > { %929 = dma.vmem_to_hbm [thread:$0]  (%p1223_p3), %s636_s15, 512, %s638_s24, %s623_s22, %s1122_s28, %s1122_s28, %s1123_s16  }
 0x173 PF: > { %s652_s23 = sand.u32 1, %s1104_s18   ;;  %p1334_p12 = scmp.ge.s32.totalorder %s1116_s21, 2 }
 0x174   : > { %s653_s26 = scalar_lea.sflag [#allocation4], %s652_s23 }
 0x175   : > { %p940_p13 = pnand %p1334_p12, %p1189_p6 }
 0x177   : > { %p941_p0 = pneg %p940_p13 }
 0x179   : > { %1099 = dma.done.wait (%p941_p0), %s653_s26, 512  }
 0x17a   : > { %1101 = vsyncadd (%p941_p0), %s653_s26, 4294966784  ;;  %p19_p5 = scmp.ge.s32.totalorder %s1207_s7, 4   ;;  %s1335_s18 = smov %s1108_s19 }
 0x17b   : > { %s1336_s19 = smov %s1112_s20  ;;  %s1337_s20 = smov %s1219_s12 }
 0x17c   : > { %s1338_s21 = smov %s1207_s7  ;;  %21 = sbr.rel (!%p19_p5) target bundleno = 6 (0x6), region = 89 }
 0x181   :  { %659 = vsyncpa [#allocation3], 1 }
 0x182   :  { %661 = vsyncpa [#allocation3 + $0x1], 1 }
 0x183   :  { %662 = vsyncpa [#allocation6], 1 }
 0x184   :  { %663 = vsyncpa [#allocation4], 1 }
 0x185   :  { %665 = vsyncpa [#allocation4 + $0x1], 1 }

</bundles_post_ra>
